<compile_context>
chip_gen: v7x
topology: tpu7x:2x2x1
jax: 0.10.0
libtpu: 0.0.40
codegen_flags: <defaults>
</compile_context>

<pallas_src>
import jax
import jax.numpy as jnp
from jax.experimental import pallas as pl
from jax.experimental.pallas import tpu as pltpu


def _round_up(x, m):
    return ((x + m - 1) // m) * m


# ----------------------------------------------------------------------------
# Fused Pallas kernel: one row-tile of the batch through the entire MLP.
# ----------------------------------------------------------------------------
def _encoder_fused_kernel(x_ref, *refs):
    """refs = (w1, b1, w2, b2, ..., wL, bL, o_ref); all VMEM-resident.

    Computes  h = relu(... relu(relu(x @ w1 + b1) @ w2 + b2) ... @ wL + bL)
    for one (TM, D_in) row-tile entirely on-chip.  Matmul operands are bf16
    (MXU native), accumulation + bias + ReLU are f32 (VPU-friendly on v5e).
    """
    o_ref = refs[-1]
    wb = refs[:-1]
    n_layers = len(wb) // 2

    h = x_ref[...]  # bf16 (TM, D_in)
    for i in range(n_layers):
        w_ref = wb[2 * i]       # bf16 (fin, fout), full block
        b_ref = wb[2 * i + 1]   # f32  (1,  fout), full block
        acc = jnp.dot(h, w_ref[...], preferred_element_type=jnp.float32)
        act = jnp.maximum(acc + b_ref[...], 0.0)        # f32 bias + ReLU
        h = act.astype(jnp.bfloat16) if i + 1 < n_layers else act
    o_ref[...] = h.astype(o_ref.dtype)


# ----------------------------------------------------------------------------
# Parameters (PyTorch semantics: xavier_normal_ weights, zero biases)
# ----------------------------------------------------------------------------
def init_encoder_params(key, inp_dim, hidden_size, latent_dim, no_layers=3):
    """Returns a list of (W, b) in PyTorch layout: W (out, in), b (out,), f32."""
    in_features = 1
    for d in inp_dim:
        in_features *= int(d)
    dims = [in_features] + [hidden_size] * (no_layers + 1) + [latent_dim]
    keys = jax.random.split(key, len(dims) - 1)
    params = []
    for k, fin, fout in zip(keys, dims[:-1], dims[1:]):
        std = (2.0 / (fin + fout)) ** 0.5  # xavier_normal_
        w = std * jax.random.normal(k, (fout, fin), dtype=jnp.float32)
        b = jnp.zeros((fout,), dtype=jnp.float32)
        params.append((w, b))
    return params


def prepare_params_for_kernel(params):
    """One-time layout prep (outside jit): transpose to (in, out) matmul layout,
    cast weights to bf16 (halves HBM traffic, native MXU dtype), keep biases in
    f32 as (1, fout) rows.  NO zero padding -- full-array blocks are exempt
    from the (8,128) BlockSpec divisibility rule."""
    prepared = []
    for w, b in params:
        wt = jnp.asarray(w.T, dtype=jnp.bfloat16)          # (fin, fout) bf16
        bp = jnp.asarray(b, dtype=jnp.float32).reshape(1, -1)  # (1, fout) f32
        prepared.append((wt, bp))
    return prepared


# ----------------------------------------------------------------------------
# Forward pass
# ----------------------------------------------------------------------------
def encoder_forward(prepared_params, x):
    """x: (B, *inp_dim) -> (B, latent_dim).  Matches Encoder.forward (ReLU
    after every Linear, including the last)."""
    B = x.shape[0]
    x2 = x.reshape(B, -1).astype(jnp.bfloat16)   # flatten + bf16 cast (cheap)
    d_in = x2.shape[1]
    latent_dim = prepared_params[-1][0].shape[1]

    # --- batch tiling: minimal padding, MXU-filling tiles for large B -------
    b_pad8 = _round_up(B, 8)
    if b_pad8 <= 512:
        tm = b_pad8            # single grid step, zero wasted rows
        b_pad = b_pad8
    else:
        tm = 256               # fills 256-row MXU (v6e/v7x); grid >= 2 so the
        b_pad = _round_up(b_pad8, tm)  # "parallel" axis shards across v7x TCs
    if b_pad != B:
        x2 = jnp.pad(x2, ((0, b_pad - B), (0, 0)))
    grid = (b_pad // tm,)

    # --- specs ---------------------------------------------------------------
    # x: row-tiled; feature dim spans the full array (no feature padding).
    in_specs = [pl.BlockSpec((tm, d_in), lambda i: (i, 0))]
    flat_wb = []
    for w, b in prepared_params:
        # Full-array blocks -> VMEM-resident across the whole grid, no re-DMA.
        in_specs.append(pl.BlockSpec(w.shape, lambda i: (0, 0)))
        in_specs.append(pl.BlockSpec(b.shape, lambda i: (0, 0)))
        flat_wb += [w, b]

    # --- accurate cost estimate (true dims / dtypes, not padded) -------------
    flops = sum(2 * B * w.shape[0] * w.shape[1] for w, _ in prepared_params)
    bytes_accessed = (
        B * d_in * 2                                            # bf16 input
        + sum(w.size * 2 + b.size * 4 for w, b in prepared_params)
        + B * latent_dim * 4                                    # f32 output
    )

    out = pl.pallas_call(
        _encoder_fused_kernel,
        out_shape=jax.ShapeDtypeStruct((b_pad, latent_dim), jnp.float32),
        grid=grid,
        in_specs=in_specs,
        out_specs=pl.BlockSpec((tm, latent_dim), lambda i: (i, 0)),
        compiler_params=pltpu.CompilerParams(
            dimension_semantics=("parallel",),
        ),
        cost_estimate=pl.CostEstimate(
            flops=flops, transcendentals=0, bytes_accessed=bytes_accessed
        ),
    )(x2, *flat_wb)

    return out[:B]


# ----------------------------------------------------------------------------
# Pure-JAX references for correctness checks
# ----------------------------------------------------------------------------
def encoder_reference_f32(params, x):
    """Strict f32 reference in PyTorch layout (module semantics)."""
    h = x.reshape(x.shape[0], -1).astype(jnp.float32)
    for w, b in params:
        h = jnp.maximum(h @ w.T + b, 0.0)
    return h


def encoder_reference_bf16(params, x):
    """Reference that mimics the kernel's bf16 operand quantization."""
    h = x.reshape(x.shape[0], -1).astype(jnp.bfloat16).astype(jnp.float32)
    n = len(params)
    for i, (w, b) in enumerate(params):
        wq = w.astype(jnp.bfloat16).astype(jnp.float32)
        h = jnp.maximum(h @ wq.T + b, 0.0)
        if i + 1 < n:
            h = h.astype(jnp.bfloat16).astype(jnp.float32)
    return h


if __name__ == "__main__":
    # Shapes implied by the module: inp_dim is an image shape that is flattened.
    inp_dim = (4, 16, 16)   # prod = 1024
    hidden_size = 32
    latent_dim = 8
    no_layers = 3
    batch = 2

    key = jax.random.PRNGKey(0)
    k_params, k_x = jax.random.split(key)

    params = init_encoder_params(k_params, inp_dim, hidden_size, latent_dim, no_layers)
    prepared = prepare_params_for_kernel(params)   # one-time layout/dtype prep

    x = jax.random.normal(k_x, (batch,) + inp_dim, dtype=jnp.float32)

    fwd = jax.jit(encoder_forward)
    out = jax.block_until_ready(fwd(prepared, x))

    ref_bf16 = encoder_reference_bf16(params, x)   # matches kernel arithmetic
    ref_f32 = encoder_reference_f32(params, x)     # strict module semantics

    assert out.shape == (batch, latent_dim), out.shape
    assert out.dtype == jnp.float32
    assert bool(jnp.all(jnp.isfinite(out)))
    # Tight check vs the bf16-matched reference (only MXU accumulation-order
    # rounding differs).
    assert bool(jnp.allclose(out, ref_bf16, rtol=1e-2, atol=1e-2)), float(
        jnp.max(jnp.abs(out - ref_bf16))
    )
    # Looser check vs the strict f32 module reference (bf16 operand rounding
    # accumulated over 5 layers).
    assert bool(jnp.allclose(out, ref_f32, rtol=1e-1, atol=1e-1)), float(
        jnp.max(jnp.abs(out - ref_f32))
    )
    print("KERNEL_OK")
</pallas_src>

<mosaic_0001>
module attributes {stable_mosaic.version = 11 : i64} {
  func.func @_encoder_fused_kernel(%arg0: i32, %arg1: memref<8x1024xbf16, #tpu.memory_space<vmem>>, %arg2: memref<1024x32xbf16, #tpu.memory_space<vmem>>, %arg3: memref<1x32xf32, #tpu.memory_space<vmem>>, %arg4: memref<32x32xbf16, #tpu.memory_space<vmem>>, %arg5: memref<1x32xf32, #tpu.memory_space<vmem>>, %arg6: memref<32x32xbf16, #tpu.memory_space<vmem>>, %arg7: memref<1x32xf32, #tpu.memory_space<vmem>>, %arg8: memref<32x32xbf16, #tpu.memory_space<vmem>>, %arg9: memref<1x32xf32, #tpu.memory_space<vmem>>, %arg10: memref<32x8xbf16, #tpu.memory_space<vmem>>, %arg11: memref<1x8xf32, #tpu.memory_space<vmem>>, %arg12: memref<8x8xf32, #tpu.memory_space<vmem>>) attributes {dimension_semantics = [#tpu.dimension_semantics<parallel>], iteration_bounds = array<i64: 1>, scalar_prefetch = 0 : i64, scratch_operands = 0 : i64, tpu.core_type = #tpu.core_type<tc>, window_params = [{transform_indices = @transform_0, window_bounds = array<i64: 8, 1024>}, {pipeline_mode = #tpu.pipeline_mode<synchronous>, transform_indices = @transform_1, window_bounds = array<i64: 1024, 32>}, {pipeline_mode = #tpu.pipeline_mode<synchronous>, transform_indices = @transform_2, window_bounds = array<i64: 1, 32>}, {pipeline_mode = #tpu.pipeline_mode<synchronous>, transform_indices = @transform_3, window_bounds = array<i64: 32, 32>}, {pipeline_mode = #tpu.pipeline_mode<synchronous>, transform_indices = @transform_4, window_bounds = array<i64: 1, 32>}, {pipeline_mode = #tpu.pipeline_mode<synchronous>, transform_indices = @transform_5, window_bounds = array<i64: 32, 32>}, {pipeline_mode = #tpu.pipeline_mode<synchronous>, transform_indices = @transform_6, window_bounds = array<i64: 1, 32>}, {pipeline_mode = #tpu.pipeline_mode<synchronous>, transform_indices = @transform_7, window_bounds = array<i64: 32, 32>}, {pipeline_mode = #tpu.pipeline_mode<synchronous>, transform_indices = @transform_8, window_bounds = array<i64: 1, 32>}, {pipeline_mode = #tpu.pipeline_mode<synchronous>, transform_indices = @transform_9, window_bounds = array<i64: 32, 8>}, {pipeline_mode = #tpu.pipeline_mode<synchronous>, transform_indices = @transform_10, window_bounds = array<i64: 1, 8>}, {transform_indices = @transform_11, window_bounds = array<i64: 8, 8>}]} {
    %c0 = arith.constant 0 : index
    %c0_0 = arith.constant 0 : index
    %0 = vector.load %arg1[%c0, %c0_0] : memref<8x1024xbf16, #tpu.memory_space<vmem>>, vector<8x1024xbf16>
    %c0_1 = arith.constant 0 : index
    %c0_2 = arith.constant 0 : index
    %1 = vector.load %arg2[%c0_1, %c0_2] : memref<1024x32xbf16, #tpu.memory_space<vmem>>, vector<1024x32xbf16>
    %cst = arith.constant dense<0.000000e+00> : vector<8x32xf32>
    %2 = tpu.matmul %0, %1, %cst {dimension_numbers = #tpu.dot_dimension_numbers<[1], [0], [0], [1], [0, 0, 1, 1], [], []>} : vector<8x1024xbf16>, vector<1024x32xbf16>, vector<8x32xf32> -> vector<8x32xf32>
    %c0_3 = arith.constant 0 : index
    %c0_4 = arith.constant 0 : index
    %3 = vector.load %arg3[%c0_3, %c0_4] : memref<1x32xf32, #tpu.memory_space<vmem>>, vector<1x32xf32>
    %4 = vector.broadcast %3 : vector<1x32xf32> to vector<8x32xf32>
    %5 = arith.addf %2, %4 : vector<8x32xf32>
    %cst_5 = arith.constant 0.000000e+00 : f32
    %6 = vector.broadcast %cst_5 : f32 to vector<8x32xf32>
    %7 = arith.maximumf %5, %6 : vector<8x32xf32>
    %8 = arith.truncf %7 : vector<8x32xf32> to vector<8x32xbf16>
    %c0_6 = arith.constant 0 : index
    %c0_7 = arith.constant 0 : index
    %9 = vector.load %arg4[%c0_6, %c0_7] : memref<32x32xbf16, #tpu.memory_space<vmem>>, vector<32x32xbf16>
    %cst_8 = arith.constant dense<0.000000e+00> : vector<8x32xf32>
    %10 = tpu.matmul %8, %9, %cst_8 {dimension_numbers = #tpu.dot_dimension_numbers<[1], [0], [0], [1], [0, 0, 1, 1], [], []>} : vector<8x32xbf16>, vector<32x32xbf16>, vector<8x32xf32> -> vector<8x32xf32>
    %c0_9 = arith.constant 0 : index
    %c0_10 = arith.constant 0 : index
    %11 = vector.load %arg5[%c0_9, %c0_10] : memref<1x32xf32, #tpu.memory_space<vmem>>, vector<1x32xf32>
    %12 = vector.broadcast %11 : vector<1x32xf32> to vector<8x32xf32>
    %13 = arith.addf %10, %12 : vector<8x32xf32>
    %cst_11 = arith.constant 0.000000e+00 : f32
    %14 = vector.broadcast %cst_11 : f32 to vector<8x32xf32>
    %15 = arith.maximumf %13, %14 : vector<8x32xf32>
    %16 = arith.truncf %15 : vector<8x32xf32> to vector<8x32xbf16>
    %c0_12 = arith.constant 0 : index
    %c0_13 = arith.constant 0 : index
    %17 = vector.load %arg6[%c0_12, %c0_13] : memref<32x32xbf16, #tpu.memory_space<vmem>>, vector<32x32xbf16>
    %cst_14 = arith.constant dense<0.000000e+00> : vector<8x32xf32>
    %18 = tpu.matmul %16, %17, %cst_14 {dimension_numbers = #tpu.dot_dimension_numbers<[1], [0], [0], [1], [0, 0, 1, 1], [], []>} : vector<8x32xbf16>, vector<32x32xbf16>, vector<8x32xf32> -> vector<8x32xf32>
    %c0_15 = arith.constant 0 : index
    %c0_16 = arith.constant 0 : index
    %19 = vector.load %arg7[%c0_15, %c0_16] : memref<1x32xf32, #tpu.memory_space<vmem>>, vector<1x32xf32>
    %20 = vector.broadcast %19 : vector<1x32xf32> to vector<8x32xf32>
    %21 = arith.addf %18, %20 : vector<8x32xf32>
    %cst_17 = arith.constant 0.000000e+00 : f32
    %22 = vector.broadcast %cst_17 : f32 to vector<8x32xf32>
    %23 = arith.maximumf %21, %22 : vector<8x32xf32>
    %24 = arith.truncf %23 : vector<8x32xf32> to vector<8x32xbf16>
    %c0_18 = arith.constant 0 : index
    %c0_19 = arith.constant 0 : index
    %25 = vector.load %arg8[%c0_18, %c0_19] : memref<32x32xbf16, #tpu.memory_space<vmem>>, vector<32x32xbf16>
    %cst_20 = arith.constant dense<0.000000e+00> : vector<8x32xf32>
    %26 = tpu.matmul %24, %25, %cst_20 {dimension_numbers = #tpu.dot_dimension_numbers<[1], [0], [0], [1], [0, 0, 1, 1], [], []>} : vector<8x32xbf16>, vector<32x32xbf16>, vector<8x32xf32> -> vector<8x32xf32>
    %c0_21 = arith.constant 0 : index
    %c0_22 = arith.constant 0 : index
    %27 = vector.load %arg9[%c0_21, %c0_22] : memref<1x32xf32, #tpu.memory_space<vmem>>, vector<1x32xf32>
    %28 = vector.broadcast %27 : vector<1x32xf32> to vector<8x32xf32>
    %29 = arith.addf %26, %28 : vector<8x32xf32>
    %cst_23 = arith.constant 0.000000e+00 : f32
    %30 = vector.broadcast %cst_23 : f32 to vector<8x32xf32>
    %31 = arith.maximumf %29, %30 : vector<8x32xf32>
    %32 = arith.truncf %31 : vector<8x32xf32> to vector<8x32xbf16>
    %c0_24 = arith.constant 0 : index
    %c0_25 = arith.constant 0 : index
    %33 = vector.load %arg10[%c0_24, %c0_25] : memref<32x8xbf16, #tpu.memory_space<vmem>>, vector<32x8xbf16>
    %cst_26 = arith.constant dense<0.000000e+00> : vector<8x8xf32>
    %34 = tpu.matmul %32, %33, %cst_26 {dimension_numbers = #tpu.dot_dimension_numbers<[1], [0], [0], [1], [0, 0, 1, 1], [], []>} : vector<8x32xbf16>, vector<32x8xbf16>, vector<8x8xf32> -> vector<8x8xf32>
    %c0_27 = arith.constant 0 : index
    %c0_28 = arith.constant 0 : index
    %35 = vector.load %arg11[%c0_27, %c0_28] : memref<1x8xf32, #tpu.memory_space<vmem>>, vector<1x8xf32>
    %36 = vector.broadcast %35 : vector<1x8xf32> to vector<8x8xf32>
    %37 = arith.addf %34, %36 : vector<8x8xf32>
    %cst_29 = arith.constant 0.000000e+00 : f32
    %38 = vector.broadcast %cst_29 : f32 to vector<8x8xf32>
    %39 = arith.maximumf %37, %38 : vector<8x8xf32>
    %c0_30 = arith.constant 0 : index
    %c0_31 = arith.constant 0 : index
    %40 = vector.load %arg12[%c0_30, %c0_31] : memref<8x8xf32, #tpu.memory_space<vmem>>, vector<8x8xf32>
    tpu.vector_store %arg12[%c0_30, %c0_31], %39 {strides = array<i32>} : memref<8x8xf32, #tpu.memory_space<vmem>>, vector<8x8xf32>,
    return
  }
  func.func @transform_0(%arg0: i32) -> (i32, i32) {
    %c0_i32 = arith.constant 0 : i32
    %c0_i32_0 = arith.constant 0 : i32
    return %arg0, %c0_i32 : i32, i32
  }
  func.func @transform_1(%arg0: i32) -> (i32, i32) {
    %c0_i32 = arith.constant 0 : i32
    %c0_i32_0 = arith.constant 0 : i32
    %c0_i32_1 = arith.constant 0 : i32
    return %c0_i32, %c0_i32_0 : i32, i32
  }
  func.func @transform_2(%arg0: i32) -> (i32, i32) {
    %c0_i32 = arith.constant 0 : i32
    %c0_i32_0 = arith.constant 0 : i32
    %c0_i32_1 = arith.constant 0 : i32
    return %c0_i32, %c0_i32_0 : i32, i32
  }
  func.func @transform_3(%arg0: i32) -> (i32, i32) {
    %c0_i32 = arith.constant 0 : i32
    %c0_i32_0 = arith.constant 0 : i32
    %c0_i32_1 = arith.constant 0 : i32
    return %c0_i32, %c0_i32_0 : i32, i32
  }
  func.func @transform_4(%arg0: i32) -> (i32, i32) {
    %c0_i32 = arith.constant 0 : i32
    %c0_i32_0 = arith.constant 0 : i32
    %c0_i32_1 = arith.constant 0 : i32
    return %c0_i32, %c0_i32_0 : i32, i32
  }
  func.func @transform_5(%arg0: i32) -> (i32, i32) {
    %c0_i32 = arith.constant 0 : i32
    %c0_i32_0 = arith.constant 0 : i32
    %c0_i32_1 = arith.constant 0 : i32
    return %c0_i32, %c0_i32_0 : i32, i32
  }
  func.func @transform_6(%arg0: i32) -> (i32, i32) {
    %c0_i32 = arith.constant 0 : i32
    %c0_i32_0 = arith.constant 0 : i32
    %c0_i32_1 = arith.constant 0 : i32
    return %c0_i32, %c0_i32_0 : i32, i32
  }
  func.func @transform_7(%arg0: i32) -> (i32, i32) {
    %c0_i32 = arith.constant 0 : i32
    %c0_i32_0 = arith.constant 0 : i32
    %c0_i32_1 = arith.constant 0 : i32
    return %c0_i32, %c0_i32_0 : i32, i32
  }
  func.func @transform_8(%arg0: i32) -> (i32, i32) {
    %c0_i32 = arith.constant 0 : i32
    %c0_i32_0 = arith.constant 0 : i32
    %c0_i32_1 = arith.constant 0 : i32
    return %c0_i32, %c0_i32_0 : i32, i32
  }
  func.func @transform_9(%arg0: i32) -> (i32, i32) {
    %c0_i32 = arith.constant 0 : i32
    %c0_i32_0 = arith.constant 0 : i32
    %c0_i32_1 = arith.constant 0 : i32
    return %c0_i32, %c0_i32_0 : i32, i32
  }
  func.func @transform_10(%arg0: i32) -> (i32, i32) {
    %c0_i32 = arith.constant 0 : i32
    %c0_i32_0 = arith.constant 0 : i32
    %c0_i32_1 = arith.constant 0 : i32
    return %c0_i32, %c0_i32_0 : i32, i32
  }
  func.func @transform_11(%arg0: i32) -> (i32, i32) {
    %c0_i32 = arith.constant 0 : i32
    %c0_i32_0 = arith.constant 0 : i32
    return %arg0, %c0_i32 : i32, i32
  }
}

</mosaic_0001>

<bundles_post_ra>
// kernel: encoder_forward.1
= control target key start
LH: loop header
LB: loop body
LE: loop exit
PB: predicated region body
PF: predicated region fallthrough
CT: control target
= control target key end

     0   :  { %vm1334_vm0 = vmmov 0   ;;  %vm775_vm1 = vcmask 261120   ;;  %vm1024_vm2 = vcmask 64512   ;;  %s1661_s1 = inlined_call_operand.vmem [shape: bf16[1024,32], index: 1, kind: input, shape index: {}]   ;;  %s1662_s0 = inlined_call_operand.vmem [shape: bf16[8,1024], index: 0, kind: input, shape index: {}]   ;;  %s1663_s3 = inlined_call_operand.vmem [shape: bf16[32,32], index: 3, kind: input, shape index: {}]   ;;  %s1664_s5 = inlined_call_operand.vmem [shape: bf16[32,32], index: 5, kind: input, shape index: {}]   ;;  %s1665_s2 = inlined_call_operand.vmem [shape: f32[1,32], index: 2, kind: input, shape index: {}]   ;;  %s1666_s7 = inlined_call_operand.vmem [shape: bf16[32,32], index: 7, kind: input, shape index: {}]   ;;  %s1667_s4 = inlined_call_operand.vmem [shape: f32[1,32], index: 4, kind: input, shape index: {}]   ;;  %s1668_s9 = inlined_call_operand.vmem [shape: bf16[32,8], index: 9, kind: input, shape index: {}]   ;;  %s1669_s6 = inlined_call_operand.vmem [shape: f32[1,32], index: 6, kind: input, shape index: {}]   ;;  %s1670_s8 = inlined_call_operand.vmem [shape: f32[1,32], index: 8, kind: input, shape index: {}]   ;;  %s1671_s10 = inlined_call_operand.vmem [shape: f32[1,8], index: 10, kind: input, shape index: {}]   ;;  %s1672_s11 = inlined_call_operand.vmem [shape: f32[8,8], index: 11, kind: output, shape index: {}]  }
   0x1   :  { %v1253_v0 = vld [vmem:[%s1661_s1 + $0x40] sm:$0xff]   ;;  %v1257_v4 = vld [vmem:[%s1661_s1 + $0x48] sm:$0xff]   ;;  %v1261_v8 = vld [vmem:[%s1661_s1 + $0x50] sm:$0xff]  }
   0x2   :  { %v1254_v1 = vld [vmem:[%s1661_s1 + $0xc0] sm:$0xff]   ;;  %1119 = vmatprep.subr.bf16.mxu0 %v1253_v0  ;;  %v1258_v5 = vld [vmem:[%s1661_s1 + $0xc8] sm:$0xff]   ;;  %v1262_v9 = vld [vmem:[%s1661_s1 + $0xd0] sm:$0xff]  }
   0x3   :  { %v1255_v2 = vld [vmem:[%s1661_s1] sm:$0xff]   ;;  %1141 = vmatprep.subr.bf16.mxu1 %v1254_v1  ;;  %v1259_v6 = vld [vmem:[%s1661_s1 + $0x8] sm:$0xff]   ;;  %v1263_v10 = vld [vmem:[%s1661_s1 + $0x10] sm:$0xff]  }
   0x4   :  { %v1256_v3 = vld [vmem:[%s1661_s1 + $0x80] sm:$0xff]   ;;  %1120 = vmatpush3.bf16.msra.mxu0 %v1255_v2  ;;  %v1260_v7 = vld [vmem:[%s1661_s1 + $0x88] sm:$0xff]   ;;  %v1264_v11 = vld [vmem:[%s1661_s1 + $0x90] sm:$0xff]  }
   0x5   :  { %1142 = vmatpush3.bf16.msra.mxu1 %v1256_v3  ;;  %1121 = vmatprep.subr.bf16.mxu0 %v1257_v4  ;;  %v1265_v12 = vld [vmem:[%s1661_s1 + $0x58] sm:$0xff]   ;;  %v1269_v16 = vld [vmem:[%s1661_s1 + $0x60] sm:$0xff]   ;;  %v1273_v20 = vld [vmem:[%s1661_s1 + $0x68] sm:$0xff]  }
   0x6   :  { %1143 = vmatprep.subr.bf16.mxu1 %v1258_v5  ;;  %v1266_v13 = vld [vmem:[%s1661_s1 + $0xd8] sm:$0xff]   ;;  %v1270_v17 = vld [vmem:[%s1661_s1 + $0xe0] sm:$0xff]   ;;  %v1274_v21 = vld [vmem:[%s1661_s1 + $0xe8] sm:$0xff]  }
   0x7   :  { %v1267_v14 = vld [vmem:[%s1661_s1 + $0x18] sm:$0xff]   ;;  %v1271_v18 = vld [vmem:[%s1661_s1 + $0x20] sm:$0xff]   ;;  %v1275_v22 = vld [vmem:[%s1661_s1 + $0x28] sm:$0xff]  }
   0x8   :  { %1122 = vmatpush3.bf16.msra.mxu0 %v1259_v6  ;;  %v1268_v15 = vld [vmem:[%s1661_s1 + $0x98] sm:$0xff]   ;;  %v1272_v19 = vld [vmem:[%s1661_s1 + $0xa0] sm:$0xff]   ;;  %v1276_v23 = vld [vmem:[%s1661_s1 + $0xa8] sm:$0xff]  }
   0x9   :  { %1144 = vmatpush3.bf16.msra.mxu1 %v1260_v7  ;;  %1123 = vmatprep.subr.bf16.mxu0 %v1261_v8  ;;  %v1277_v24 = vld [vmem:[%s1661_s1 + $0x70] sm:$0xff]   ;;  %v1281_v28 = vld [vmem:[%s1661_s1 + $0x78] sm:$0xff]   ;;  %v39_v32 = vld [vmem:[%s1662_s0] sm:$0xff] }
   0xa   :  { %1145 = vmatprep.subr.bf16.mxu1 %v1262_v9  ;;  %v1278_v25 = vld [vmem:[%s1661_s1 + $0xf0] sm:$0xff]   ;;  %v1282_v29 = vld [vmem:[%s1661_s1 + $0xf8] sm:$0xff]   ;;  %v40_v33 = vld [vmem:[%s1662_s0 + $0x8] sm:$0xff]  ;;  %v1031_v34 = vcombine.low %v39_v32, %v39_v32  ;;  %v1032_v35 = vcombine.high %v39_v32, %v39_v32 }
   0xb   :  { %v1279_v26 = vld [vmem:[%s1661_s1 + $0x30] sm:$0xff]   ;;  %v1283_v30 = vld [vmem:[%s1661_s1 + $0x38] sm:$0xff]   ;;  %v1033_v36 = vcombine.low %v40_v33, %v40_v33  ;;  %v1034_v37 = vcombine.high %v40_v33, %v40_v33  ;;  %v1289_v38 = vld [vmem:[%s1661_s1 + $0x140] sm:$0xff]  }
   0xc   :  { %1124 = vmatpush3.bf16.msra.mxu0 %v1263_v10  ;;  %v1280_v27 = vld [vmem:[%s1661_s1 + $0xb0] sm:$0xff]   ;;  %v1284_v31 = vld [vmem:[%s1661_s1 + $0xb8] sm:$0xff]   ;;  %v1290_v39 = vld [vmem:[%s1661_s1 + $0x1c0] sm:$0xff]   ;;  %622 = vmatprep.mubr.bf16.mxu0 %v1032_v35 }
   0xd   :  { %1146 = vmatpush3.bf16.msra.mxu1 %v1264_v11  ;;  %1125 = vmatprep.subr.bf16.mxu0 %v1265_v12  ;;  %v1291_v40 = vld [vmem:[%s1661_s1 + $0x100] sm:$0xff]   ;;  %v1293_v42 = vld [vmem:[%s1661_s1 + $0x148] sm:$0xff]   ;;  %v1297_v46 = vld [vmem:[%s1661_s1 + $0x150] sm:$0xff]  }
   0xe   :  { %1147 = vmatprep.subr.bf16.mxu1 %v1266_v13  ;;  %662 = vmatprep.mubr.bf16.mxu1 %v1034_v37  ;;  %v1292_v41 = vld [vmem:[%s1661_s1 + $0x180] sm:$0xff]   ;;  %v1294_v43 = vld [vmem:[%s1661_s1 + $0x1c8] sm:$0xff]   ;;  %v1298_v47 = vld [vmem:[%s1661_s1 + $0x1d0] sm:$0xff]   ;;  %v1333_v13 = vmov 0.0  }
   0xf   :  { %v1295_v44 = vld [vmem:[%s1661_s1 + $0x108] sm:$0xff]   ;;  %v1299_v48 = vld [vmem:[%s1661_s1 + $0x110] sm:$0xff]   ;;  %v1301_v50 = vld [vmem:[%s1661_s1 + $0x158] sm:$0xff]  }
  0x10   :  { %1126 = vmatpush3.bf16.msra.mxu0 %v1267_v14  ;;  %v1296_v45 = vld [vmem:[%s1661_s1 + $0x188] sm:$0xff]   ;;  %v1300_v49 = vld [vmem:[%s1661_s1 + $0x190] sm:$0xff]   ;;  %v1302_v51 = vld [vmem:[%s1661_s1 + $0x1d8] sm:$0xff]  }
  0x11   :  { %1148 = vmatpush3.bf16.msra.mxu1 %v1268_v15  ;;  %1127 = vmatprep.subr.bf16.mxu0 %v1269_v16  ;;  %v1303_v52 = vld [vmem:[%s1661_s1 + $0x118] sm:$0xff]   ;;  %v1305_v54 = vld [vmem:[%s1661_s1 + $0x160] sm:$0xff]   ;;  %v1309_v58 = vld [vmem:[%s1661_s1 + $0x168] sm:$0xff]  }
  0x12   :  { %1149 = vmatprep.subr.bf16.mxu1 %v1270_v17  ;;  %v1304_v53 = vld [vmem:[%s1661_s1 + $0x198] sm:$0xff]   ;;  %v1306_v55 = vld [vmem:[%s1661_s1 + $0x1e0] sm:$0xff]   ;;  %v1310_v59 = vld [vmem:[%s1661_s1 + $0x1e8] sm:$0xff]  }
  0x13   :  { %v1307_v56 = vld [vmem:[%s1661_s1 + $0x120] sm:$0xff]   ;;  %v1311_v60 = vld [vmem:[%s1661_s1 + $0x128] sm:$0xff]   ;;  %v1313_v62 = vld [vmem:[%s1661_s1 + $0x170] sm:$0xff]  }
  0x14   :  { %1128 = vmatpush3.bf16.msra.mxu0 %v1271_v18  ;;  %v1308_v57 = vld [vmem:[%s1661_s1 + $0x1a0] sm:$0xff]   ;;  %v1312_v61 = vld [vmem:[%s1661_s1 + $0x1a8] sm:$0xff]   ;;  %v1314_v63 = vld [vmem:[%s1661_s1 + $0x1f0] sm:$0xff]  }
  0x15   :  { %1150 = vmatpush3.bf16.msra.mxu1 %v1272_v19  ;;  %1129 = vmatprep.subr.bf16.mxu0 %v1273_v20  ;;  %v1315_v0 = vld [vmem:[%s1661_s1 + $0x130] sm:$0xff]   ;;  %v1317_v2 = vld [vmem:[%s1661_s1 + $0x178] sm:$0xff]   ;;  %v1325_v12 = vld [vmem:[%s1663_s3] sm:$0xff]  }
  0x16   :  { %1151 = vmatprep.subr.bf16.mxu1 %v1274_v21  ;;  %v1316_v1 = vld [vmem:[%s1661_s1 + $0x1b0] sm:$0xff]   ;;  %v1318_v3 = vld [vmem:[%s1661_s1 + $0x1f8] sm:$0xff]   ;;  %v1326_v14 = vld [vmem:[%s1663_s3 + $0x8] sm:$0xff]  }
  0x17   :  { %v1319_v4 = vld [vmem:[%s1661_s1 + $0x138] sm:$0xff]   ;;  %v41_v6 = vld [vmem:[%s1662_s0 + $0x10] sm:$0xff]  ;;  %v1327_v15 = vld [vmem:[%s1664_s5] sm:$0xff]  }
  0x18   :  { %1130 = vmatpush3.bf16.msra.mxu0 %v1275_v22  ;;  %v1320_v5 = vld [vmem:[%s1661_s1 + $0x1b8] sm:$0xff]   ;;  %v1035_v7 = vcombine.low %v41_v6, %v41_v6  ;;  %v1036_v8 = vcombine.high %v41_v6, %v41_v6  ;;  %v1030_v18 = vld [vmem:[%s1665_s2] ss:$0 sm:$0xff] }
  0x19   :  { %1152 = vmatpush3.bf16.msra.mxu1 %v1276_v23  ;;  %1131 = vmatprep.subr.bf16.mxu0 %v1277_v24  ;;  %v42_v9 = vld [vmem:[%s1662_s0 + $0x18] sm:$0xff] }
  0x1a   :  { %1153 = vmatprep.subr.bf16.mxu1 %v1278_v25  ;;  %v1037_v10 = vcombine.low %v42_v9, %v42_v9  ;;  %v1038_v11 = vcombine.high %v42_v9, %v42_v9 }
  0x1c   :  { %1132 = vmatpush3.bf16.msra.mxu0 %v1279_v26 }
  0x1d   :  { %1154 = vmatpush3.bf16.msra.mxu1 %v1280_v27  ;;  %1133 = vmatprep.subr.bf16.mxu0 %v1281_v28 }
  0x1e   :  { %1155 = vmatprep.subr.bf16.mxu1 %v1282_v29 }
  0x20   :  { %1134 = vmatpush3.bf16.msra.mxu0 %v1283_v30 }
  0x21   :  { %1156 = vmatpush3.bf16.msra.mxu1 %v1284_v31  ;;  %1163 = vmatprep.subr.bf16.mxu0 %v1289_v38 }
  0x22   :  { %1185 = vmatprep.subr.bf16.mxu1 %v1290_v39 }
  0x23   :  { %623 = vmatmul.mubr.bf16.vlgmr.msra.gmra.mrb[0].mxu0 %v1031_v34 }
  0x24   :  { %663 = vmatmul.mubr.bf16.vlgmr.msra.gmra.mrb[0].mxu1 %v1033_v36  ;;  %1164 = vmatpush3.bf16.msra.mxu0 %v1291_v40 }
  0x25   :  { %1186 = vmatpush3.bf16.msra.mxu1 %v1292_v41  ;;  %1165 = vmatprep.subr.bf16.mxu0 %v1293_v42 }
  0x26   :  { %1187 = vmatprep.subr.bf16.mxu1 %v1294_v43  ;;  %702 = vmatprep.mubr.bf16.mxu0 %v1036_v8  ;;  %v1328_v43 = vld [vmem:[%s1664_s5 + $0x8] sm:$0xff]   ;;  %v1115_v8 = vld [vmem:[%s1671_s10] ss:$0 sm:$0xff] }
  0x27   :  { %742 = vmatprep.mubr.bf16.mxu1 %v1038_v11 }
  0x28   :  { %1166 = vmatpush3.bf16.msra.mxu0 %v1295_v44  ;;  %v1329_v44 = vld [vmem:[%s1666_s7] sm:$0xff]  }
  0x29   :  { %1188 = vmatpush3.bf16.msra.mxu1 %v1296_v45  ;;  %1167 = vmatprep.subr.bf16.mxu0 %v1297_v46  ;;  %v1103_v45 = vld [vmem:[%s1667_s4] ss:$0 sm:$0xff] }
  0x2a   :  { %1189 = vmatprep.subr.bf16.mxu1 %v1298_v47 }
  0x2c   :  { %1168 = vmatpush3.bf16.msra.mxu0 %v1299_v48 }
  0x2d   :  { %1190 = vmatpush3.bf16.msra.mxu1 %v1300_v49  ;;  %1169 = vmatprep.subr.bf16.mxu0 %v1301_v50 }
  0x2e   :  { %1191 = vmatprep.subr.bf16.mxu1 %v1302_v51 }
  0x30   :  { %1170 = vmatpush3.bf16.msra.mxu0 %v1303_v52 }
  0x31   :  { %1192 = vmatpush3.bf16.msra.mxu1 %v1304_v53  ;;  %1171 = vmatprep.subr.bf16.mxu0 %v1305_v54  ;;  %v1330_v53 = vld [vmem:[%s1666_s7 + $0x8] sm:$0xff]   ;;  %v1331_v54 = vld [vmem:[%s1668_s9] sm:$0xff]  }
  0x32   :  { %1193 = vmatprep.subr.bf16.mxu1 %v1306_v55  ;;  %v1107_v55 = vld [vmem:[%s1669_s6] ss:$0 sm:$0xff] }
  0x34   :  { %1172 = vmatpush3.bf16.msra.mxu0 %v1307_v56 }
  0x35   :  { %1194 = vmatpush3.bf16.msra.mxu1 %v1308_v57  ;;  %1173 = vmatprep.subr.bf16.mxu0 %v1309_v58 }
  0x36   :  { %1195 = vmatprep.subr.bf16.mxu1 %v1310_v59 }
  0x38   :  { %1174 = vmatpush3.bf16.msra.mxu0 %v1311_v60 }
  0x39   :  { %1196 = vmatpush3.bf16.msra.mxu1 %v1312_v61  ;;  %1175 = vmatprep.subr.bf16.mxu0 %v1313_v62 }
  0x3a   :  { %1197 = vmatprep.subr.bf16.mxu1 %v1314_v63  ;;  %v1332_v63 = vld [vmem:[%s1668_s9 + $0x8] sm:$0xff]  }
  0x3c   :  { %1176 = vmatpush3.bf16.msra.mxu0 %v1315_v0  ;;  %v1111_v0 = vld [vmem:[%s1670_s8] ss:$0 sm:$0xff] }
  0x3d   :  { %1198 = vmatpush3.bf16.msra.mxu1 %v1316_v1  ;;  %1177 = vmatprep.subr.bf16.mxu0 %v1317_v2 }
  0x3e   :  { %1199 = vmatprep.subr.bf16.mxu1 %v1318_v3 }
  0x40   :  { %1178 = vmatpush3.bf16.msra.mxu0 %v1319_v4 }
  0x41   :  { %1200 = vmatpush3.bf16.msra.mxu1 %v1320_v5  ;;  %1219 = vmatprep.subr.bf16.mxu0 %v1333_v13 }
  0x42   :  { %1227 = vmatprep.subr.bf16.mxu1 %v1333_v13 }
  0x43   :  { %703 = vmatmul.mubr.bf16.vlgmr.msra.gmra.mrb[4].mxu0 %v1035_v7 }
  0x44   :  { %743 = vmatmul.mubr.bf16.vlgmr.msra.gmra.mrb[4].mxu1 %v1037_v10  ;;  %1220 = vmatpush3.bf16.msra.mxu0 %v1325_v12 }
  0x45   :  { %1221 = vmatprep.subr.bf16.mxu0 %v1333_v13  ;;  %1223 = vmatprep.mubr.msk.bf16.mxu0 %vm1334_vm0, %v1333_v13 }
  0x46   :  { %1231 = vmatprep.mubr.msk.bf16.mxu1 %vm1334_vm0, %v1333_v13  ;;  %1228 = vmatpush3.bf16.msra.mxu1 %v1327_v15 }
  0x47   :  { %1229 = vmatprep.subr.bf16.mxu1 %v1333_v13 }
  0x48   :  { %1222 = vmatpush3.bf16.msra.mxu0 %v1326_v14 }
  0x49   :  { %1235 = vmatprep.subr.bf16.mxu0 %v1333_v13 }
  0x4a   :  { %1230 = vmatpush3.bf16.msra.mxu1 %v1328_v43 }
  0x4b   :  { %1243 = vmatprep.subr.bf16.mxu1 %v1333_v13 }
  0xf6   :  { %v1135_v16 = vpop.f32.mrb[0].mxu0 }
  0xf7   :  { %v1157_v17 = vpop.f32.mrb[0].mxu1  ;;  %v1136_v19 = vpop.f32.mrb[1].mxu0 }
  0xf8   :  { %v1158_v20 = vpop.f32.mrb[1].mxu1  ;;  %v1137_v21 = vadd.f32 %v1136_v19, %v1135_v16  ;;  %v1138_v23 = vpop.f32.mrb[2].mxu0 }
  0xf9   :  { %v1159_v22 = vadd.f32 %v1158_v20, %v1157_v17  ;;  %v1160_v24 = vpop.f32.mrb[2].mxu1  ;;  %v1139_v25 = vpop.f32.mrb[3].mxu0 }
  0xfa   :  { %v1161_v26 = vpop.f32.mrb[3].mxu1  ;;  %v625_v27 = vadd.f32 %v1137_v21, %v1030_v18 }
  0xfc   :  { %v665_v28 = vadd.f32 %v1159_v22, %v625_v27 }
 0x116   :  { %v1179_v29 = vpop.f32.mrb[4].mxu0 }
 0x117   :  { %v1201_v30 = vpop.f32.mrb[4].mxu1  ;;  %v1180_v31 = vpop.f32.mrb[5].mxu0 }
 0x118   :  { %v1202_v32 = vpop.f32.mrb[5].mxu1  ;;  %v1181_v33 = vadd.f32 %v1180_v31, %v1179_v29  ;;  %v1182_v35 = vpop.f32.mrb[6].mxu0 }
 0x119   :  { %v1203_v34 = vadd.f32 %v1202_v32, %v1201_v30  ;;  %v1204_v36 = vpop.f32.mrb[6].mxu1  ;;  %v1183_v37 = vpop.f32.mrb[7].mxu0 }
 0x11a   :  { %v1205_v38 = vpop.f32.mrb[7].mxu1  ;;  %v705_v39 = vadd.f32 %v1181_v33, %v665_v28 }
 0x11c   :  { %v745_v40 = vadd.f32 %v1203_v34, %v705_v39 }
 0x11e   :  { %v750_v41 = vmax.f32 %v745_v40, 0.0 }
 0x120   :  { %v751_v42 = vpack.c.bf16 %v750_v41, %v750_v41 }
 0x122   :  { %1224 = vmatmul.mubr.msk.bf16.vlgmr.msra.gmra.mrb[8].mxu0 %vm775_vm1, %v751_v42 }
 0x123   :  { %1239 = vmatprep.mubr.msk.bf16.mxu0 %vm1334_vm0, %v1333_v13  ;;  %1236 = vmatpush3.bf16.msra.mxu0 %v1329_v44 }
 0x124   :  { %1237 = vmatprep.subr.bf16.mxu0 %v1333_v13 }
 0x127   :  { %1238 = vmatpush3.bf16.msra.mxu0 %v1330_v53 }
 0x1f5   :  { %v813_v46 = vpop.f32.mrb[8].mxu0 }
 0x1f6   :  { %v814_v47 = vadd.f32 %v1103_v45, %v813_v46  ;;  %v1225_v48 = vpop.f32.mrb[9].mxu0 }
 0x1f7   :  { %v816_v49 = vpop.f32.mrb[10].mxu0 }
 0x1f8   :  { %v819_v50 = vmax.f32 %v814_v47, 0.0  ;;  %v1226_v51 = vpop.f32.mrb[11].mxu0 }
 0x1fa   :  { %v820_v52 = vpack.c.bf16 %v819_v50, %v819_v50 }
 0x1fc   :  { %1232 = vmatmul.mubr.msk.bf16.vlgmr.msra.gmra.mrb[8].mxu1 %vm775_vm1, %v820_v52 }
 0x1fd   :  { %1247 = vmatprep.mubr.msk.bf16.mxu1 %vm1334_vm0, %v1333_v13  ;;  %1244 = vmatpush3.bf16.msra.mxu1 %v1331_v54 }
 0x1fe   :  { %1245 = vmatprep.subr.bf16.mxu1 %v1333_v13 }
 0x201   :  { %1246 = vmatpush3.bf16.msra.mxu1 %v1332_v63 }
 0x2cf   :  { %v881_v56 = vpop.f32.mrb[8].mxu1 }
 0x2d0   :  { %v882_v57 = vadd.f32 %v1107_v55, %v881_v56  ;;  %v1233_v58 = vpop.f32.mrb[9].mxu1 }
 0x2d1   :  { %v884_v59 = vpop.f32.mrb[10].mxu1 }
 0x2d2   :  { %v887_v60 = vmax.f32 %v882_v57, 0.0  ;;  %v1234_v61 = vpop.f32.mrb[11].mxu1 }
 0x2d4   :  { %v888_v62 = vpack.c.bf16 %v887_v60, %v887_v60 }
 0x2d6   :  { %1240 = vmatmul.mubr.msk.bf16.vlgmr.msra.gmra.mrb[12].mxu0 %vm775_vm1, %v888_v62 }
 0x3a9   :  { %v949_v1 = vpop.f32.mrb[12].mxu0 }
 0x3aa   :  { %v950_v2 = vadd.f32 %v1111_v0, %v949_v1  ;;  %v1241_v3 = vpop.f32.mrb[13].mxu0 }
 0x3ab   :  { %v952_v4 = vpop.f32.mrb[14].mxu0 }
 0x3ac   :  { %v955_v5 = vmax.f32 %v950_v2, 0.0  ;;  %v1242_v6 = vpop.f32.mrb[15].mxu0 }
 0x3ae   :  { %v956_v7 = vpack.c.bf16 %v955_v5, %v955_v5 }
 0x3b0   :  { %1248 = vmatmul.mubr.msk.bf16.vlgmr.msra.gmra.mrb[12].mxu1 %vm775_vm1, %v956_v7 }
 0x483   :  { %v1017_v9 = vpop.f32.mrb[12].mxu1 }
 0x484   :  { %v1018_v10 = vadd.f32 %v1115_v8, %v1017_v9  ;;  %v1249_v11 = vpop.f32.mrb[13].mxu1 }
 0x485   :  { %v1020_v12 = vpop.f32.mrb[14].mxu1 }
 0x486   :  { %v1023_v13 = vmax.f32 %v1018_v10, 0.0  ;;  %v1250_v14 = vpop.f32.mrb[15].mxu1 }
 0x488   :  { %1025 = vst.msk [vmem:[%s1672_s11] sm:$0xff] %vm1024_vm2, %v1023_v13 }

</bundles_post_ra>
